<compile_context>
chip_gen: v7x
topology: tpu7x:2x2x1
jax: 0.10.0
libtpu: 0.0.40
codegen_flags: <defaults>
</compile_context>

<pallas_src>
import functools

import jax
import jax.numpy as jnp
from jax.experimental import pallas as pl
from jax.experimental.pallas import tpu as pltpu


def bert_output_kernel(h_ref, res_ref, w_ref, b_ref, g_ref, beta_ref,
                       o_ref, acc_ref, *, eps):
    """Grid = (M/tm rows, I/tk reduction). acc_ref: (tm, H) f32 accumulator."""
    k = pl.program_id(1)

    @pl.when(k == 0)
    def _init():
        acc_ref[...] = jnp.zeros_like(acc_ref)

    # Partial dense: [tm, tk] @ [tk, H] -> accumulate in f32 on the MXU.
    acc_ref[...] += jnp.dot(h_ref[...], w_ref[...],
                            preferred_element_type=jnp.float32)

    @pl.when(k == pl.num_programs(1) - 1)
    def _finalize():
        # TODO(synk): dropout omitted (inference / p=0 semantics -> identity).
        x = acc_ref[...] + b_ref[...] + res_ref[...].astype(jnp.float32)

        # TF-style LayerNorm (eps inside sqrt), single pass over x:
        # mean and E[x^2] in one sweep, var = E[x^2] - mean^2, rsqrt on the EUP.
        inv_h = 1.0 / x.shape[-1]
        mean = jnp.sum(x, axis=-1, keepdims=True) * inv_h
        mean_sq = jnp.sum(x * x, axis=-1, keepdims=True) * inv_h
        var = mean_sq - mean * mean
        xn = (x - mean) * jax.lax.rsqrt(var + eps)
        y = g_ref[...] * xn + beta_ref[...]
        o_ref[...] = y.astype(o_ref.dtype)


def _largest_tile(n, cap, step):
    """Largest multiple of `step` that divides n and is <= cap (falls back to n)."""
    if n <= cap:
        return n
    t = cap - (cap % step)
    while t >= step:
        if n % t == 0:
            return t
        t -= step
    return n


def bert_output(hidden_states, input_tensor, weight, bias, gamma, beta,
                *, eps=1e-12, tm=256, tk=512, compute_dtype=jnp.bfloat16):
    """hidden_states: [B, S, I], input_tensor: [B, S, H], weight: [I, H] (out = hs @ W + b)."""
    B, S, I = hidden_states.shape
    H = input_tensor.shape[-1]
    M = B * S
    assert M % 8 == 0, "rows (batch*seq) must be a multiple of 8"

    tm = _largest_tile(M, tm, 8)     # row tile (multiple of sublane tile)
    tk = _largest_tile(I, tk, 128)   # reduction tile (lane-aligned or full I)
    kt = I // tk

    out_dtype = input_tensor.dtype

    # bf16 operands for the MXU; params hoisted to f32 once here (not per grid step).
    hs2 = hidden_states.reshape(M, I).astype(compute_dtype)
    w2 = weight.astype(compute_dtype)
    res2 = input_tensor.reshape(M, H)
    b2 = bias.reshape(1, H).astype(jnp.float32)
    g2 = gamma.reshape(1, H).astype(jnp.float32)
    be2 = beta.reshape(1, H).astype(jnp.float32)

    # Deliberate VMEM budget: double-buffered streamed tiles + resident params + scratch.
    cbytes = jnp.dtype(compute_dtype).itemsize
    vmem_bytes = (
        2 * tm * tk * cbytes                            # hidden_states tiles
        + 2 * tk * H * cbytes                           # weight tiles
        + 2 * tm * H * res2.dtype.itemsize              # residual tiles
        + 2 * tm * H * jnp.dtype(out_dtype).itemsize    # output tiles
        + 3 * 2 * H * 4                                 # bias/gamma/beta
        + tm * H * 4                                    # f32 accumulator scratch
    )
    vmem_limit = min(max(int(vmem_bytes * 1.5) + (4 << 20), 16 << 20), 64 << 20)

    cost = pl.CostEstimate(
        flops=2 * M * I * H,
        transcendentals=M,  # one rsqrt per row
        bytes_accessed=(hs2.size * cbytes + w2.size * cbytes + res2.nbytes
                        + M * H * jnp.dtype(out_dtype).itemsize
                        + b2.nbytes + g2.nbytes + be2.nbytes),
    )

    kernel = functools.partial(bert_output_kernel, eps=eps)

    out = pl.pallas_call(
        kernel,
        out_shape=jax.ShapeDtypeStruct((M, H), out_dtype),
        grid_spec=pltpu.PrefetchScalarGridSpec(
            num_scalar_prefetch=0,
            grid=(M // tm, kt),                               # reduction axis last
            in_specs=[
                pl.BlockSpec((tm, tk), lambda i, k: (i, k)),  # hidden_states rows x K-slice
                pl.BlockSpec((tm, H), lambda i, k: (i, 0)),   # residual rows (resident over k)
                pl.BlockSpec((tk, H), lambda i, k: (k, 0)),   # weight K-slice
                pl.BlockSpec((1, H), lambda i, k: (0, 0)),    # dense bias (f32)
                pl.BlockSpec((1, H), lambda i, k: (0, 0)),    # LayerNorm gamma (f32)
                pl.BlockSpec((1, H), lambda i, k: (0, 0)),    # LayerNorm beta (f32)
            ],
            out_specs=pl.BlockSpec((tm, H), lambda i, k: (i, 0)),
            scratch_shapes=[pltpu.VMEM((tm, H), jnp.float32)],
        ),
        compiler_params=pltpu.CompilerParams(
            dimension_semantics=("parallel", "arbitrary"),
            vmem_limit_bytes=vmem_limit,
        ),
        cost_estimate=cost,
    )(hs2, res2, w2, b2, g2, be2)
    return out.reshape(B, S, H)


def reference(hidden_states, input_tensor, weight, bias, gamma, beta, eps=1e-12):
    x = jnp.einsum("bsi,ih->bsh", hidden_states, weight) + bias
    x = x + input_tensor
    u = jnp.mean(x, axis=-1, keepdims=True)
    s = jnp.mean((x - u) ** 2, axis=-1, keepdims=True)
    x = (x - u) / jnp.sqrt(s + eps)
    return gamma * x + beta


if __name__ == "__main__":
    # Small config: batch=2, seq=8, hidden=32, intermediate=64.
    B, S, H, I = 2, 8, 32, 64
    key = jax.random.PRNGKey(0)
    k1, k2, k3, k4 = jax.random.split(key, 4)

    hidden_states = jax.random.normal(k1, (B, S, I), dtype=jnp.float32)
    input_tensor = jax.random.normal(k2, (B, S, H), dtype=jnp.float32)
    # Deterministic parameter init (nn.Linear-like scale), gamma=1, beta=0.
    weight = jax.random.normal(k3, (I, H), dtype=jnp.float32) * (1.0 / jnp.sqrt(I))
    bias = jax.random.normal(k4, (H,), dtype=jnp.float32) * 0.01
    gamma = jnp.ones((H,), dtype=jnp.float32)
    beta = jnp.zeros((H,), dtype=jnp.float32)

    out = bert_output(hidden_states, input_tensor, weight, bias, gamma, beta)
    out = jax.block_until_ready(out)

    ref = reference(hidden_states, input_tensor, weight, bias, gamma, beta)
    assert out.shape == (B, S, H)
    # bf16 matmul operands (f32 accumulation + f32 LayerNorm) -> relaxed tolerance.
    assert jnp.allclose(out, ref, atol=2e-2, rtol=2e-2), "mismatch vs reference"
    print("KERNEL_OK")
</pallas_src>

<mosaic_0001>
module attributes {stable_mosaic.version = 11 : i64} {
  func.func @bert_output_kernel(%arg0: i32, %arg1: i32, %arg2: memref<16x64xbf16, #tpu.memory_space<vmem>>, %arg3: memref<16x32xf32, #tpu.memory_space<vmem>>, %arg4: memref<64x32xbf16, #tpu.memory_space<vmem>>, %arg5: memref<1x32xf32, #tpu.memory_space<vmem>>, %arg6: memref<1x32xf32, #tpu.memory_space<vmem>>, %arg7: memref<1x32xf32, #tpu.memory_space<vmem>>, %arg8: memref<16x32xf32, #tpu.memory_space<vmem>>, %arg9: memref<16x32xf32, #tpu.memory_space<vmem>>) attributes {dimension_semantics = [#tpu.dimension_semantics<parallel>, #tpu.dimension_semantics<arbitrary>], iteration_bounds = array<i64: 1, 1>, scalar_prefetch = 0 : i64, scratch_operands = 1 : i64, tpu.core_type = #tpu.core_type<tc>, window_params = [{transform_indices = @transform_0, window_bounds = array<i64: 16, 64>}, {transform_indices = @transform_1, window_bounds = array<i64: 16, 32>}, {transform_indices = @transform_2, window_bounds = array<i64: 64, 32>}, {pipeline_mode = #tpu.pipeline_mode<synchronous>, transform_indices = @transform_3, window_bounds = array<i64: 1, 32>}, {pipeline_mode = #tpu.pipeline_mode<synchronous>, transform_indices = @transform_4, window_bounds = array<i64: 1, 32>}, {pipeline_mode = #tpu.pipeline_mode<synchronous>, transform_indices = @transform_5, window_bounds = array<i64: 1, 32>}, {transform_indices = @transform_6, window_bounds = array<i64: 16, 32>}]} {
    %c0_i32 = arith.constant 0 : i32
    %0 = arith.cmpi eq, %arg1, %c0_i32 : i32
    %1 = arith.extui %0 : i1 to i32
    %c0_i32_0 = arith.constant 0 : i32
    %2 = arith.cmpi ne, %1, %c0_i32_0 : i32
    scf.if %2 {
      %cst_10 = arith.constant 0.000000e+00 : f32
      %12 = vector.broadcast %cst_10 : f32 to vector<16x32xf32>
      %c0_11 = arith.constant 0 : index
      %c0_12 = arith.constant 0 : index
      %13 = vector.load %arg9[%c0_11, %c0_12] : memref<16x32xf32, #tpu.memory_space<vmem>>, vector<16x32xf32>
      tpu.vector_store %arg9[%c0_11, %c0_12], %12 {strides = array<i32>} : memref<16x32xf32, #tpu.memory_space<vmem>>, vector<16x32xf32>,
    } else {
    }
    %c0 = arith.constant 0 : index
    %c0_1 = arith.constant 0 : index
    %3 = vector.load %arg9[%c0, %c0_1] : memref<16x32xf32, #tpu.memory_space<vmem>>, vector<16x32xf32>
    %c0_2 = arith.constant 0 : index
    %c0_3 = arith.constant 0 : index
    %4 = vector.load %arg2[%c0_2, %c0_3] : memref<16x64xbf16, #tpu.memory_space<vmem>>, vector<16x64xbf16>
    %c0_4 = arith.constant 0 : index
    %c0_5 = arith.constant 0 : index
    %5 = vector.load %arg4[%c0_4, %c0_5] : memref<64x32xbf16, #tpu.memory_space<vmem>>, vector<64x32xbf16>
    %cst = arith.constant dense<0.000000e+00> : vector<16x32xf32>
    %6 = tpu.matmul %4, %5, %cst {dimension_numbers = #tpu.dot_dimension_numbers<[1], [0], [0], [1], [0, 0, 1, 1], [], []>} : vector<16x64xbf16>, vector<64x32xbf16>, vector<16x32xf32> -> vector<16x32xf32>
    %7 = arith.addf %3, %6 : vector<16x32xf32>
    %c0_6 = arith.constant 0 : index
    %c0_7 = arith.constant 0 : index
    %8 = vector.load %arg9[%c0_6, %c0_7] : memref<16x32xf32, #tpu.memory_space<vmem>>, vector<16x32xf32>
    tpu.vector_store %arg9[%c0_6, %c0_7], %7 {strides = array<i32>} : memref<16x32xf32, #tpu.memory_space<vmem>>, vector<16x32xf32>,
    %c0_i32_8 = arith.constant 0 : i32
    %9 = arith.cmpi eq, %arg1, %c0_i32_8 : i32
    %10 = arith.extui %9 : i1 to i32
    %c0_i32_9 = arith.constant 0 : i32
    %11 = arith.cmpi ne, %10, %c0_i32_9 : i32
    scf.if %11 {
      %c0_10 = arith.constant 0 : index
      %c0_11 = arith.constant 0 : index
      %12 = vector.load %arg9[%c0_10, %c0_11] : memref<16x32xf32, #tpu.memory_space<vmem>>, vector<16x32xf32>
      %c0_12 = arith.constant 0 : index
      %c0_13 = arith.constant 0 : index
      %13 = vector.load %arg5[%c0_12, %c0_13] : memref<1x32xf32, #tpu.memory_space<vmem>>, vector<1x32xf32>
      %14 = vector.broadcast %13 : vector<1x32xf32> to vector<16x32xf32>
      %15 = arith.addf %12, %14 : vector<16x32xf32>
      %c0_14 = arith.constant 0 : index
      %c0_15 = arith.constant 0 : index
      %16 = vector.load %arg3[%c0_14, %c0_15] : memref<16x32xf32, #tpu.memory_space<vmem>>, vector<16x32xf32>
      %17 = arith.addf %15, %16 : vector<16x32xf32>
      %cst_16 = arith.constant dense<0.000000e+00> : vector<16xf32>
      %18 = vector.multi_reduction <add>, %17, %cst_16 [1] : vector<16x32xf32> to vector<16xf32>
      %19 = vector.shape_cast %18 : vector<16xf32> to vector<16x1xf32>
      %cst_17 = arith.constant 3.125000e-02 : f32
      %20 = vector.broadcast %cst_17 : f32 to vector<16x1xf32>
      %21 = arith.mulf %19, %20 : vector<16x1xf32>
      %22 = arith.mulf %17, %17 : vector<16x32xf32>
      %cst_18 = arith.constant dense<0.000000e+00> : vector<16xf32>
      %23 = vector.multi_reduction <add>, %22, %cst_18 [1] : vector<16x32xf32> to vector<16xf32>
      %24 = vector.shape_cast %23 : vector<16xf32> to vector<16x1xf32>
      %cst_19 = arith.constant 3.125000e-02 : f32
      %25 = vector.broadcast %cst_19 : f32 to vector<16x1xf32>
      %26 = arith.mulf %24, %25 : vector<16x1xf32>
      %27 = arith.mulf %21, %21 : vector<16x1xf32>
      %28 = arith.subf %26, %27 : vector<16x1xf32>
      %29 = vector.broadcast %21 : vector<16x1xf32> to vector<16x32xf32>
      %30 = arith.subf %17, %29 : vector<16x32xf32>
      %cst_20 = arith.constant 9.99999996E-13 : f32
      %31 = vector.broadcast %cst_20 : f32 to vector<16x1xf32>
      %32 = arith.addf %28, %31 : vector<16x1xf32>
      %33 = math.rsqrt %32 : vector<16x1xf32>
      %34 = vector.broadcast %33 : vector<16x1xf32> to vector<16x32xf32>
      %35 = arith.mulf %30, %34 : vector<16x32xf32>
      %c0_21 = arith.constant 0 : index
      %c0_22 = arith.constant 0 : index
      %36 = vector.load %arg6[%c0_21, %c0_22] : memref<1x32xf32, #tpu.memory_space<vmem>>, vector<1x32xf32>
      %37 = vector.broadcast %36 : vector<1x32xf32> to vector<16x32xf32>
      %38 = arith.mulf %37, %35 : vector<16x32xf32>
      %c0_23 = arith.constant 0 : index
      %c0_24 = arith.constant 0 : index
      %39 = vector.load %arg7[%c0_23, %c0_24] : memref<1x32xf32, #tpu.memory_space<vmem>>, vector<1x32xf32>
      %40 = vector.broadcast %39 : vector<1x32xf32> to vector<16x32xf32>
      %41 = arith.addf %38, %40 : vector<16x32xf32>
      %c0_25 = arith.constant 0 : index
      %c0_26 = arith.constant 0 : index
      %42 = vector.load %arg8[%c0_25, %c0_26] : memref<16x32xf32, #tpu.memory_space<vmem>>, vector<16x32xf32>
      tpu.vector_store %arg8[%c0_25, %c0_26], %41 {strides = array<i32>} : memref<16x32xf32, #tpu.memory_space<vmem>>, vector<16x32xf32>,
    } else {
    }
    return
  }
  func.func @transform_0(%arg0: i32, %arg1: i32) -> (i32, i32) {
    %c0_i32 = arith.constant 0 : i32
    return %arg0, %arg1 : i32, i32
  }
  func.func @transform_1(%arg0: i32, %arg1: i32) -> (i32, i32) {
    %c0_i32 = arith.constant 0 : i32
    %c0_i32_0 = arith.constant 0 : i32
    return %arg0, %c0_i32 : i32, i32
  }
  func.func @transform_2(%arg0: i32, %arg1: i32) -> (i32, i32) {
    %c0_i32 = arith.constant 0 : i32
    %c0_i32_0 = arith.constant 0 : i32
    return %arg1, %c0_i32 : i32, i32
  }
  func.func @transform_3(%arg0: i32, %arg1: i32) -> (i32, i32) {
    %c0_i32 = arith.constant 0 : i32
    %c0_i32_0 = arith.constant 0 : i32
    %c0_i32_1 = arith.constant 0 : i32
    return %c0_i32, %c0_i32_0 : i32, i32
  }
  func.func @transform_4(%arg0: i32, %arg1: i32) -> (i32, i32) {
    %c0_i32 = arith.constant 0 : i32
    %c0_i32_0 = arith.constant 0 : i32
    %c0_i32_1 = arith.constant 0 : i32
    return %c0_i32, %c0_i32_0 : i32, i32
  }
  func.func @transform_5(%arg0: i32, %arg1: i32) -> (i32, i32) {
    %c0_i32 = arith.constant 0 : i32
    %c0_i32_0 = arith.constant 0 : i32
    %c0_i32_1 = arith.constant 0 : i32
    return %c0_i32, %c0_i32_0 : i32, i32
  }
  func.func @transform_6(%arg0: i32, %arg1: i32) -> (i32, i32) {
    %c0_i32 = arith.constant 0 : i32
    %c0_i32_0 = arith.constant 0 : i32
    return %arg0, %c0_i32 : i32, i32
  }
}

</mosaic_0001>

<bundles_post_ra>
// kernel: tpu_custom_call.1
= control target key start
LH: loop header
LB: loop body
LE: loop exit
PB: predicated region body
PF: predicated region fallthrough
CT: control target
= control target key end

     0   :  { %v271_v1 = vmov 0.0   ;;  %vm272_vm0 = vmmov 0   ;;  %vm29_vm1 = vcmask 261120   ;;  %s363_s0 = inlined_call_operand.vmem [shape: bf16[16,64], index: 0, kind: input, shape index: {}]   ;;  %s364_s1 = inlined_call_operand.vmem [shape: f32[16,32], index: 1, kind: input, shape index: {}]   ;;  %s365_s2 = inlined_call_operand.vmem [shape: bf16[64,32], index: 2, kind: input, shape index: {}]   ;;  %s366_s3 = inlined_call_operand.vmem [shape: f32[1,32], index: 3, kind: input, shape index: {}]   ;;  %s367_s4 = inlined_call_operand.vmem [shape: f32[1,32], index: 4, kind: input, shape index: {}]   ;;  %s368_s5 = inlined_call_operand.vmem [shape: f32[1,32], index: 5, kind: input, shape index: {}]   ;;  %s369_s6 = inlined_call_operand.hbm [shape: f32[16,32], index: 6, kind: output, shape index: {}]  }
   0x1   :  { %v238_v0 = vld [vmem:[%s365_s2] sm:$0xff]   ;;  %221 = vmatprep.subr.bf16.mxu0 %v271_v1  ;;  %v239_v2 = vld [vmem:[%s365_s2 + $0x8] sm:$0xff]   ;;  %229 = vmatprep.mubr.msk.bf16.mxu0 %vm272_vm0, %v271_v1  ;;  %30 = vst.msk [vmem:[#allocation2] sm:$0xff] %vm29_vm1, %v271_v1  ;;  %31 = vst.msk [vmem:[#allocation2 + $0x8] sm:$0xff] %vm29_vm1, %v271_v1 }
   0x2   :  { %222 = vmatpush3.bf16.msra.mxu0 %v238_v0 }
   0x3   :  { %223 = vmatprep.subr.bf16.mxu0 %v271_v1 }
   0x4   :  { %11 = vsyncpa [#allocation4], 0  ;;  %v240_v3 = vld [vmem:[%s365_s2 + $0x10] sm:$0xff]   ;;  %v241_v4 = vld [vmem:[%s365_s2 + $0x18] sm:$0xff]   ;;  %vm73_vm2 = vcmask 523264   ;;  %s273_s13 = smov [#allocation3]  }
   0x5   :  { %v242_v5 = vld [vmem:[%s363_s0] sm:$0xff]   ;;  %v138_v19 = vld [vmem:[%s364_s1 + $0x8] sm:$0xff]  ;;  %s196_s14 = sshll.u32 %s273_s13, 4  ;;  %s197_s14 = int_to_ptr.vmem [resolvable:$true] %s196_s14 }
   0x6   :  { %224 = vmatpush3.bf16.msra.mxu0 %v239_v2  ;;  %v213_v14 = vld [vmem:[%s366_s3] ss:$0 sm:$0xff]  ;;  %p252_p1 = scmp.lt.s32.totalorder %s197_s14, %s197_s14 }
   0x7   :  { %225 = vmatprep.subr.bf16.mxu0 %v271_v1  ;;  %v137_v16 = vld [vmem:[%s364_s1] sm:$0xff] }
   0x8   :  { %v32_v6 = vld [vmem:[#allocation2] sm:$0xff]  ;;  %v33_v8 = vld [vmem:[#allocation2 + $0x8] sm:$0xff] }
   0x9   :  { %v214_v45 = vld [vmem:[%s367_s4] ss:$0 sm:$0xff]  ;;  %s247_s4 = scalar_lea.vmem %s197_s14, 256 }
   0xa   :  { %226 = vmatpush3.bf16.msra.mxu0 %v240_v3  ;;  %v215_v47 = vld [vmem:[%s368_s5] ss:$0 sm:$0xff]  ;;  %p248_p0 = scmp.ne.s32.totalorder %s197_s14, %s247_s4  ;;  %p253_p2 = scmp.lt.s32.totalorder %s247_s4, %s247_s4 }
   0xb   :  { %227 = vmatprep.subr.bf16.mxu0 %v271_v1 }
   0xc   :  { %p254_p3 = por %p253_p2, %p252_p1 }
   0xe   :  { %228 = vmatpush3.bf16.msra.mxu0 %v241_v4  ;;  %p255_p4 = pnand %p254_p3, %p248_p0 }
  0x11   :  { %230 = vmatmul.mubr.msk.bf16.vlgmr.msra.gmra.mrb[0].mxu0 %vm73_vm2, %v242_v5 }
  0xe4   :  { %v111_v7 = vpop.f32.mrb[0].mxu0 }
  0xe5   :  { %v118_v9 = vadd.f32 %v111_v7, %v32_v6  ;;  %v231_v10 = vpop.f32.mrb[1].mxu0 }
  0xe6   :  { %v114_v11 = vpop.f32.mrb[2].mxu0 }
  0xe7   :  { %121 = vst.msk [vmem:[#allocation2] sm:$0xff] %vm29_vm1, %v118_v9  ;;  %v119_v12 = vadd.f32 %v114_v11, %v33_v8  ;;  %v232_v13 = vpop.f32.mrb[3].mxu0 }
  0xe9   :  { %122 = vst.msk [vmem:[#allocation2 + $0x8] sm:$0xff] %vm29_vm1, %v119_v12 }
  0xee   :  { %v126_v15 = vld [vmem:[#allocation2] sm:$0xff] }
  0xef   :  { %v135_v17 = vadd.f32 %v213_v14, %v126_v15 }
  0xf0   :  { %v127_v18 = vld [vmem:[#allocation2 + $0x8] sm:$0xff] }
  0xf1   :  { %v139_v20 = vadd.f32 %v137_v16, %v135_v17  ;;  %v136_v21 = vadd.f32 %v213_v14, %v127_v18 }
  0xf3   :  { %v141_v22 = vsel %vm29_vm1, %v139_v20, 0.0  ;;  %v149_v23 = vmul.f32 %v139_v20, %v139_v20  ;;  %v140_v24 = vadd.f32 %v138_v19, %v136_v21 }
  0xf4   :  { %142 = vadd.xlane.f32.xlu0 %v141_v22 }
  0xf5   :  { %v151_v25 = vsel %vm29_vm1, %v149_v23, 0.0  ;;  %v150_v26 = vmul.f32 %v140_v24, %v140_v24  ;;  %v144_v27 = vsel %vm29_vm1, %v140_v24, 0.0 }
  0xf6   :  { %152 = vadd.xlane.f32.xlu1 %v151_v25 }
  0xf7   :  { %v154_v28 = vsel %vm29_vm1, %v150_v26, 0.0 }
  0xf8   :  { %145 = vadd.xlane.f32.xlu0 %v144_v27 }
  0xfa   :  { %155 = vadd.xlane.f32.xlu1 %v154_v28 }
 0x181   :  { %v143_v29 = vpop.xlane.xlu0 %142 }
 0x182   :  { %v147_v30 = vmul.f32 0.03125, %v143_v29 }
 0x183   :  { %v153_v31 = vpop.xlane.xlu1 %152 }
 0x184   :  { %v159_v32 = vmul.f32 %v147_v30, %v147_v30  ;;  %v157_v33 = vmul.f32 0.03125, %v153_v31  ;;  %v163_v43 = vsub.f32 %v139_v20, %v147_v30 }
 0x185   :  { %v146_v34 = vpop.xlane.xlu0 %145 }
 0x186   :  { %v161_v35 = vsub.f32 %v157_v33, %v159_v32  ;;  %v148_v36 = vmul.f32 0.03125, %v146_v34 }
 0x187   :  { %v156_v37 = vpop.xlane.xlu1 %155 }
 0x188   :  { %v165_v38 = vadd.f32 1e-12, %v161_v35  ;;  %v160_v39 = vmul.f32 %v148_v36, %v148_v36  ;;  %v158_v40 = vmul.f32 0.03125, %v156_v37  ;;  %v164_v48 = vsub.f32 %v140_v24, %v148_v36 }
 0x18a   :  { %243 = vrsqrt.f32 %v165_v38  ;;  %v162_v41 = vsub.f32 %v158_v40, %v160_v39 }
 0x18c   :  { %v166_v42 = vadd.f32 1e-12, %v162_v41 }
 0x18e   :  { %245 = vrsqrt.f32 %v166_v42 }
 0x194   :  { %v244_v44 = vpop.eup %243 }
 0x195   :  { %v169_v46 = vmul.f32 %v244_v44, %v163_v43 }
 0x197   :  { %v178_v49 = vmul.f32 %v214_v45, %v169_v46 }
 0x198   :  { %v246_v50 = vpop.eup %245 }
 0x199   :  { %v170_v51 = vmul.f32 %v246_v50, %v164_v48  ;;  %v187_v52 = vadd.f32 %v215_v47, %v178_v49 }
 0x19b   :  { %v179_v53 = vmul.f32 %v214_v45, %v170_v51  ;;  %189 = vst.msk [vmem:[#allocation3] sm:$0xff] %vm29_vm1, %v187_v52 }
 0x19d   :  { %v188_v54 = vadd.f32 %v215_v47, %v179_v53 }
 0x19f   :  { %190 = vst.msk [vmem:[#allocation3 + $0x8] sm:$0xff] %vm29_vm1, %v188_v54 }
 0x1a0   :  { %258 = shalt.err (!%p255_p4)
}
 0x1a1   :  { %s259_s16 = scalar_lea.hbm %s369_s6, 256 }
 0x1a2   :  { %p260_p5 = scmp.ne.s32.totalorder %s369_s6, %s259_s16  ;;  %p263_p6 = scmp.lt.u32.totalorder %s259_s16, %s369_s6 }
 0x1a4   :  { %p265_p7 = pnand %p263_p6, %p260_p5 }
 0x1a6   :  { %268 = shalt.err (!%p265_p7)
}
 0x1a7   :  { %s274_s21 = smov 128   ;;  %s275_s22 = smov 8  }
 0x1a8   :  { %202 = dma.vmem_to_hbm [thread:$0]  %s197_s14, 256, %s369_s6, [#allocation4], %s274_s21, %s274_s21, %s275_s22  }
 0x1a9   :  { %269 = dma.done.wait [#allocation4], 256  }
 0x1aa   :  { %270 = vsyncadd [#allocation4], 4294967040 }
 0x1ab   :  { %206 = vsyncpa [#allocation4], 1 }

</bundles_post_ra>
